<compile_context>
chip_gen: v5e
topology: v5e:2x2
jax: 0.10.0
libtpu: 0.0.40
codegen_flags: <defaults>
</compile_context>

<pallas_src>
import math
import jax
import jax.numpy as jnp
from jax.experimental import pallas as pl
from jax.experimental.pallas import tpu as pltpu


# --------------------------------------------------------------------------- utils
def _round_up(a, b):
    return (a + b - 1) // b * b


def _cdiv(a, b):
    return (a + b - 1) // b


def _pick_tf(f_pad, tf_max, align):
    """Largest multiple of `align` that divides f_pad and is <= tf_max."""
    tf = max(align, min(tf_max, f_pad))
    tf = max(align, (tf // align) * align)
    while f_pad % tf != 0:
        tf -= align
    return tf


def _hw_config():
    """Generation-aware (lane_align, tm_default, tf_default, vmem_cap_bytes, is_v5)."""
    vmem_cap = 64 << 20                                 # conservative fallback (v7x-sized)
    try:
        info = pltpu.get_tpu_info()
        cap = getattr(info, "vmem_capacity_bytes", None)
        if cap:
            vmem_cap = int(cap)
    except Exception:
        pass
    try:
        kind = jax.devices()[0].device_kind.lower()
    except Exception:
        kind = ""
    if "v4" in kind or "v5" in kind:
        # 4x128x128 MXU, ~0.8 TB/s HBM -> roofline knee ~240 FLOP/B; 128 MiB VMEM.
        return 128, 384, 512, vmem_cap, True
    if "v7" in kind or "7x" in kind:
        # 2x256x256 MXU, ~3.2 TB/s HBM -> knee ~310 FLOP/B; only 64 MiB VMEM; 2 TCs.
        return 256, 512, 512, min(vmem_cap, 64 << 20), False
    # v6e (default): 2x256x256 MXU, ~1.4 TB/s HBM -> knee ~660 FLOP/B; 128 MiB VMEM.
    return 256, 768, 1024, vmem_cap, False


# --------------------------------------------------------------------------- kernels
def ffn_chunked_kernel(x_ref, w1_ref, b1_ref, w2_ref, b2_ref, o_ref, acc_ref):
    # x_ref:  (tm, Hp)   row tile of the input
    # w1_ref: (Hp, tF)   F-chunk of ff1 weight (pre-transposed vs PyTorch)
    # b1_ref: (1,  tF)   F-chunk of ff1 bias
    # w2_ref: (tF, Hp)   F-chunk of ff2 weight (pre-transposed vs PyTorch)
    # b2_ref: (1,  Hp)   ff2 bias
    # o_ref:  (tm, Hp)   output row tile (resident across the F axis)
    # acc_ref:(tm, Hp)   f32 accumulator scratch
    f = pl.program_id(1)
    nf = pl.num_programs(1)

    @pl.when(f == 0)
    def _init():
        # Fold b2 into the accumulator init (single broadcast, not per-iter).
        acc_ref[...] = jnp.broadcast_to(
            b2_ref[...].astype(jnp.float32), acc_ref.shape)

    # ff1 chunk: (tm, Hp) @ (Hp, tF) -> relu
    h = jnp.dot(x_ref[...], w1_ref[...], preferred_element_type=jnp.float32)
    h = jnp.maximum(h + b1_ref[...].astype(jnp.float32), 0.0)

    # ff2 chunk: accumulate (tm, tF) @ (tF, Hp) into f32 scratch
    acc_ref[...] += jnp.dot(h.astype(w2_ref.dtype), w2_ref[...],
                            preferred_element_type=jnp.float32)

    @pl.when(f == nf - 1)
    def _finalize():
        # dropout = identity (eval mode)
        o_ref[...] = acc_ref[...].astype(o_ref.dtype)


def ffn_resident_kernel(x_ref, w1_ref, b1_ref, w2_ref, b2_ref, o_ref):
    # Weights fully VMEM-resident: one pass, no F-chunk accumulator needed.
    h = jnp.dot(x_ref[...], w1_ref[...], preferred_element_type=jnp.float32)
    h = jnp.maximum(h + b1_ref[...].astype(jnp.float32), 0.0)
    y = jnp.dot(h.astype(w2_ref.dtype), w2_ref[...],
                preferred_element_type=jnp.float32)
    # dropout = identity (eval mode)
    o_ref[...] = (y + b2_ref[...].astype(jnp.float32)).astype(o_ref.dtype)


# --------------------------------------------------------------------------- params
def prepare_ffn_params(w1, b1, w2, b2):
    """One-time layout prep (transpose + pad). Keep OUT of the per-call path.

    w1: (F, H) = ff1.weight (PyTorch layout), b1: (F,), w2: (H, F) = ff2.weight, b2: (H,).
    Returns dict with W1^T (H_pad, F_pad), b1 (1, F_pad), W2^T (F_pad, H_pad), b2 (1, H_pad).
    """
    F_, H = w1.shape
    lane_align, _, _, _, _ = _hw_config()
    H_pad = _round_up(H, lane_align)
    F_pad = _round_up(F_, lane_align)
    return dict(
        w1t=jnp.pad(w1.T, ((0, H_pad - H), (0, F_pad - F_))),
        b1r=jnp.pad(b1.reshape(1, F_), ((0, 0), (0, F_pad - F_))),
        w2t=jnp.pad(w2.T, ((0, F_pad - F_), (0, H_pad - H))),
        b2r=jnp.pad(b2.reshape(1, H), ((0, 0), (0, H_pad - H))),
        hidden=H,
        h_ff=F_,
    )


# --------------------------------------------------------------------------- forward
def feed_forward_network(x, params, *, tm=None):
    """x: [B, S, H]; params from prepare_ffn_params()."""
    w1t, b1r, w2t, b2r = params["w1t"], params["b1r"], params["w2t"], params["b2r"]
    H = params["hidden"]
    B, S, Hx = x.shape
    assert Hx == H, "input hidden dim does not match params"
    M = B * S
    H_pad, F_pad = w1t.shape
    dtype = x.dtype
    x_isize = jnp.dtype(dtype).itemsize
    w_isize = jnp.dtype(w1t.dtype).itemsize

    lane_align, tm_default, tf_default, vmem_cap, is_v5 = _hw_config()
    budget = int(0.85 * vmem_cap)

    # ---- row tile: sublane aligned (16 for packed dtypes), >= 2 tiles when M allows
    row_align = 16 if x_isize < 4 else 8
    if tm is None:
        tm = tm_default
    tm = _round_up(max(row_align, min(tm, _round_up(M, row_align))), row_align)
    if _cdiv(M, tm) < 2 and M >= 2 * row_align:
        tm = _round_up(_cdiv(M, 2), row_align)   # let both v7x TensorCores get a tile
    M_pad = _round_up(M, tm)

    # ---- VMEM-need models (double-buffered tiles + live f32 intermediates) --------
    def resident_need(tm_):
        return (4 * tm_ * H_pad * x_isize                          # x + out tiles
                + 2 * (H_pad * F_pad + F_pad * H_pad) * w_isize    # W1 + W2 buffers
                + 2 * (F_pad + H_pad) * w_isize                    # biases
                + tm_ * F_pad * 4 + tm_ * H_pad * 4)               # f32 intermediates

    def chunked_need(tm_, tf_, wbuf_):
        return (4 * tm_ * H_pad * x_isize                          # x + out tiles
                + wbuf_ * (H_pad * tf_ + tf_ * H_pad) * w_isize    # W1/W2 chunk buffers
                + 2 * (tf_ + H_pad) * w_isize                      # bias chunks
                + tm_ * H_pad * 4                                  # f32 acc scratch
                + tm_ * tf_ * 4)                                   # live f32 h chunk

    use_resident = resident_need(tm) <= budget

    if use_resident:
        # Weights fully VMEM-resident: grid only over rows, no acc read-modify-write.
        vmem_need = resident_need(tm)
        grid = (M_pad // tm,)
        in_specs = [
            pl.BlockSpec((tm, H_pad),    lambda i: (i, 0)),   # x row tile
            pl.BlockSpec((H_pad, F_pad), lambda i: (0, 0)),   # W1^T (resident)
            pl.BlockSpec((1, F_pad),     lambda i: (0, 0)),   # b1
            pl.BlockSpec((F_pad, H_pad), lambda i: (0, 0)),   # W2^T (resident)
            pl.BlockSpec((1, H_pad),     lambda i: (0, 0)),   # b2
        ]
        out_specs = pl.BlockSpec((tm, H_pad), lambda i: (i, 0))
        scratch = []
        kernel = ffn_resident_kernel
        dims = ("parallel",)
        weight_passes = 1
    else:
        tf = _pick_tf(F_pad, tf_default, lane_align)
        wbuf = 3 if (is_v5 and tm <= 128) else 2   # deeper weight pipeline for tiny tm on v5e
        # shrink tf first (v7x 64 MiB guidance), then tm, until within the VMEM budget
        while chunked_need(tm, tf, wbuf) > budget and tf > lane_align:
            tf = _pick_tf(F_pad, tf - lane_align, lane_align)
        while chunked_need(tm, tf, wbuf) > budget and tm > 2 * row_align:
            tm = _round_up(tm // 2, row_align)
        M_pad = _round_up(M, tm)
        vmem_need = chunked_need(tm, tf, wbuf)
        assert vmem_need <= budget, "FFN tiles do not fit the VMEM budget"
        grid = (M_pad // tm, F_pad // tf)
        wkw = {"pipeline_mode": pl.Buffered(wbuf)} if wbuf != 2 else {}
        in_specs = [
            pl.BlockSpec((tm, H_pad), lambda i, f: (i, 0)),          # x row tile
            pl.BlockSpec((H_pad, tf), lambda i, f: (0, f), **wkw),   # W1^T chunk
            pl.BlockSpec((1, tf),     lambda i, f: (0, f)),          # b1 chunk
            pl.BlockSpec((tf, H_pad), lambda i, f: (f, 0), **wkw),   # W2^T chunk
            pl.BlockSpec((1, H_pad),  lambda i, f: (0, 0)),          # b2
        ]
        out_specs = pl.BlockSpec((tm, H_pad), lambda i, f: (i, 0))
        scratch = [pltpu.VMEM((tm, H_pad), jnp.float32)]
        kernel = ffn_chunked_kernel
        dims = ("parallel", "arbitrary")
        weight_passes = grid[0]

    vmem_limit = int(min(budget, max(2 * vmem_need, 16 << 20)))
    assert vmem_limit >= vmem_need

    # ---- pad x only when not already aligned (no per-call work otherwise) ---------
    x2d = x.reshape(M, H)
    if M_pad != M or H_pad != H:
        x2d = jnp.pad(x2d, ((0, M_pad - M), (0, H_pad - H)))

    # ---- advisory cost estimate: count the actual weight re-streaming -------------
    flops = 4 * M_pad * H_pad * F_pad
    weight_bytes = (w1t.size + w2t.size + b1r.size + b2r.size) * w_isize
    bytes_accessed = (weight_passes * weight_bytes
                      + (M_pad * H_pad) * x_isize * 2)     # x read + out write
    cost = pl.CostEstimate(flops=flops, transcendentals=0,
                           bytes_accessed=int(bytes_accessed))

    out2d = pl.pallas_call(
        kernel,
        out_shape=jax.ShapeDtypeStruct((M_pad, H_pad), dtype),
        grid_spec=pltpu.PrefetchScalarGridSpec(
            num_scalar_prefetch=0,
            grid=grid,
            in_specs=in_specs,
            out_specs=out_specs,
            scratch_shapes=scratch),
        compiler_params=pltpu.CompilerParams(
            dimension_semantics=dims,
            vmem_limit_bytes=vmem_limit),
        cost_estimate=cost,
    )(x2d, w1t, b1r, w2t, b2r)

    if M_pad != M or H_pad != H:
        out2d = out2d[:M, :H]     # padded rows/cols are garbage/zero -- must slice
    return out2d.reshape(B, S, H)


# --------------------------------------------------------------------------- init
def xavier_uniform(key, shape):
    # PyTorch xavier_uniform_ for an nn.Linear weight of shape (out, in):
    # bound = sqrt(6 / (fan_in + fan_out))
    fan_out, fan_in = shape
    bound = math.sqrt(6.0 / (fan_in + fan_out))
    return jax.random.uniform(key, shape, jnp.float32, minval=-bound, maxval=bound)


if __name__ == "__main__":
    batch, seq = 2, 8
    hidden_dimension, h_ff = 32, 64
    dropout_rate = 0.1  # identity in eval mode

    key = jax.random.PRNGKey(0)
    kx, k1, k2 = jax.random.split(key, 3)

    x = jax.random.normal(kx, (batch, seq, hidden_dimension), jnp.float32)

    # deterministic parameter init (matches the PyTorch __init__ semantics)
    w1 = xavier_uniform(k1, (h_ff, hidden_dimension))   # ff1.weight
    b1 = jnp.zeros((h_ff,), jnp.float32)                # ff1.bias
    w2 = xavier_uniform(k2, (hidden_dimension, h_ff))   # ff2.weight
    b2 = jnp.zeros((hidden_dimension,), jnp.float32)    # ff2.bias

    # one-time layout prep (out of the per-call path)
    params = prepare_ffn_params(w1, b1, w2, b2)

    out = feed_forward_network(x, params)
    jax.block_until_ready(out)

    # reference check in plain JAX
    ref = jnp.maximum(x @ w1.T + b1, 0.0) @ w2.T + b2
    assert out.shape == (batch, seq, hidden_dimension)
    assert jnp.allclose(out, ref, atol=2e-4, rtol=2e-4)

    print("KERNEL_OK")
</pallas_src>

<mosaic_0001>
module attributes {stable_mosaic.version = 11 : i64} {
  func.func @ffn_resident_kernel(%arg0: i32, %arg1: memref<8x256xf32, #tpu.memory_space<vmem>>, %arg2: memref<256x256xf32, #tpu.memory_space<vmem>>, %arg3: memref<1x256xf32, #tpu.memory_space<vmem>>, %arg4: memref<256x256xf32, #tpu.memory_space<vmem>>, %arg5: memref<1x256xf32, #tpu.memory_space<vmem>>, %arg6: memref<8x256xf32, #tpu.memory_space<vmem>>) attributes {dimension_semantics = [#tpu.dimension_semantics<parallel>], iteration_bounds = array<i64: 2>, scalar_prefetch = 0 : i64, scratch_operands = 0 : i64, tpu.core_type = #tpu.core_type<tc>, window_params = [{transform_indices = @transform_0, window_bounds = array<i64: 8, 256>}, {pipeline_mode = #tpu.pipeline_mode<synchronous>, transform_indices = @transform_1, window_bounds = array<i64: 256, 256>}, {pipeline_mode = #tpu.pipeline_mode<synchronous>, transform_indices = @transform_2, window_bounds = array<i64: 1, 256>}, {pipeline_mode = #tpu.pipeline_mode<synchronous>, transform_indices = @transform_3, window_bounds = array<i64: 256, 256>}, {pipeline_mode = #tpu.pipeline_mode<synchronous>, transform_indices = @transform_4, window_bounds = array<i64: 1, 256>}, {transform_indices = @transform_5, window_bounds = array<i64: 8, 256>}]} {
    %c0 = arith.constant 0 : index
    %c0_0 = arith.constant 0 : index
    %0 = vector.load %arg1[%c0, %c0_0] : memref<8x256xf32, #tpu.memory_space<vmem>>, vector<8x256xf32>
    %c0_1 = arith.constant 0 : index
    %c0_2 = arith.constant 0 : index
    %1 = vector.load %arg2[%c0_1, %c0_2] : memref<256x256xf32, #tpu.memory_space<vmem>>, vector<256x256xf32>
    %cst = arith.constant dense<0.000000e+00> : vector<8x256xf32>
    %2 = tpu.matmul %0, %1, %cst {dimension_numbers = #tpu.dot_dimension_numbers<[1], [0], [0], [1], [0, 0, 1, 1], [], []>} : vector<8x256xf32>, vector<256x256xf32>, vector<8x256xf32> -> vector<8x256xf32>
    %c0_3 = arith.constant 0 : index
    %c0_4 = arith.constant 0 : index
    %3 = vector.load %arg3[%c0_3, %c0_4] : memref<1x256xf32, #tpu.memory_space<vmem>>, vector<1x256xf32>
    %4 = vector.broadcast %3 : vector<1x256xf32> to vector<8x256xf32>
    %5 = arith.addf %2, %4 : vector<8x256xf32>
    %cst_5 = arith.constant 0.000000e+00 : f32
    %6 = vector.broadcast %cst_5 : f32 to vector<8x256xf32>
    %7 = arith.maximumf %5, %6 : vector<8x256xf32>
    %c0_6 = arith.constant 0 : index
    %c0_7 = arith.constant 0 : index
    %8 = vector.load %arg4[%c0_6, %c0_7] : memref<256x256xf32, #tpu.memory_space<vmem>>, vector<256x256xf32>
    %cst_8 = arith.constant dense<0.000000e+00> : vector<8x256xf32>
    %9 = tpu.matmul %7, %8, %cst_8 {dimension_numbers = #tpu.dot_dimension_numbers<[1], [0], [0], [1], [0, 0, 1, 1], [], []>} : vector<8x256xf32>, vector<256x256xf32>, vector<8x256xf32> -> vector<8x256xf32>
    %c0_9 = arith.constant 0 : index
    %c0_10 = arith.constant 0 : index
    %10 = vector.load %arg5[%c0_9, %c0_10] : memref<1x256xf32, #tpu.memory_space<vmem>>, vector<1x256xf32>
    %11 = vector.broadcast %10 : vector<1x256xf32> to vector<8x256xf32>
    %12 = arith.addf %9, %11 : vector<8x256xf32>
    %c0_11 = arith.constant 0 : index
    %c0_12 = arith.constant 0 : index
    %13 = vector.load %arg6[%c0_11, %c0_12] : memref<8x256xf32, #tpu.memory_space<vmem>>, vector<8x256xf32>
    tpu.vector_store %arg6[%c0_11, %c0_12], %12 {strides = array<i32>} : memref<8x256xf32, #tpu.memory_space<vmem>>, vector<8x256xf32>,
    return
  }
  func.func @transform_0(%arg0: i32) -> (i32, i32) {
    %c0_i32 = arith.constant 0 : i32
    %c0_i32_0 = arith.constant 0 : i32
    return %arg0, %c0_i32 : i32, i32
  }
  func.func @transform_1(%arg0: i32) -> (i32, i32) {
    %c0_i32 = arith.constant 0 : i32
    %c0_i32_0 = arith.constant 0 : i32
    %c0_i32_1 = arith.constant 0 : i32
    return %c0_i32, %c0_i32_0 : i32, i32
  }
  func.func @transform_2(%arg0: i32) -> (i32, i32) {
    %c0_i32 = arith.constant 0 : i32
    %c0_i32_0 = arith.constant 0 : i32
    %c0_i32_1 = arith.constant 0 : i32
    return %c0_i32, %c0_i32_0 : i32, i32
  }
  func.func @transform_3(%arg0: i32) -> (i32, i32) {
    %c0_i32 = arith.constant 0 : i32
    %c0_i32_0 = arith.constant 0 : i32
    %c0_i32_1 = arith.constant 0 : i32
    return %c0_i32, %c0_i32_0 : i32, i32
  }
  func.func @transform_4(%arg0: i32) -> (i32, i32) {
    %c0_i32 = arith.constant 0 : i32
    %c0_i32_0 = arith.constant 0 : i32
    %c0_i32_1 = arith.constant 0 : i32
    return %c0_i32, %c0_i32_0 : i32, i32
  }
  func.func @transform_5(%arg0: i32) -> (i32, i32) {
    %c0_i32 = arith.constant 0 : i32
    %c0_i32_0 = arith.constant 0 : i32
    return %arg0, %c0_i32 : i32, i32
  }
}

</mosaic_0001>

<bundles_post_ra>
// kernel: tpu_custom_call.1
= control target key start
LH: loop header
LB: loop body
LE: loop exit
PB: predicated region body
PF: predicated region fallthrough
CT: control target
= control target key end

     0   :  { %10 = vsyncpa [#allocation3], 0  ;;  %s1212_s0 = inlined_call_operand.hbm [shape: f32[16,256], index: 0, kind: input, shape index: {}]   ;;  %s1213_s1 = inlined_call_operand.hbm [shape: f32[256,256], index: 1, kind: input, shape index: {}]   ;;  %s1214_s2 = inlined_call_operand.hbm [shape: f32[1,256], index: 2, kind: input, shape index: {}]   ;;  %s1215_s3 = inlined_call_operand.hbm [shape: f32[256,256], index: 3, kind: input, shape index: {}]   ;;  %s1216_s4 = inlined_call_operand.vmem [shape: f32[1,256], index: 4, kind: input, shape index: {}]   ;;  %s1217_s5 = inlined_call_operand.hbm [shape: f32[16,256], index: 5, kind: output, shape index: {}]  }
   0x1   :  { %12 = vsyncpa [#allocation3 + $0x1], 0 }
   0x2   :  { %13 = vsyncpa [#allocation6], 0 }
   0x3   :  { %14 = vsyncpa [#allocation9], 0 }
   0x4   :  { %15 = vsyncpa [#allocation4], 0 }
   0x5   :  { %17 = vsyncpa [#allocation4 + $0x1], 0  ;;  %s1045_s18 = smov 0   ;;  %s1047_s19 = smov 0  }
   0x6   :  { %s1049_s20 = smov 0   ;;  %s1051_s21 = smov 0  }
   0x7 LB: > { %s175_s24 = sshll.u32 %s1213_s1, 4  ;;  %s1069_s25 = sadd.s32 4294967295, %s1008_s21   ;;  %s1008_s21 = sphi %s1051_s21, %s1228_s21   ;;  %s1004_s20 = sphi %s1049_s20, %s1227_s20   ;;  %s1000_s19 = sphi %s1047_s19, %s1226_s19   ;;  %s996_s18 = sphi %s1045_s18, %s1225_s18   ;;  %s176_s24 = int_to_ptr.hbm [resolvable:$true] %s175_s24 }
   0x8   : > { %p714_p0 = scmp.ge.s32.totalorder %s1008_s21, 1  ;;  %p44_p1 = scmp.eq.s32.totalorder %s1069_s25, 0 }
   0x9   : > { %p164_p2 = scmp.lt.s32.totalorder %s1008_s21, 3  ;;  %s1010_s27 = smov [#allocation5]  }
   0xa   : > { %s177_s28 = sshll.u32 %s1010_s27, 4  ;;  %s190_s6 = sshll.u32 %s1214_s2, 4  ;;  %s178_s28 = int_to_ptr.vmem [resolvable:$true] %s177_s28  ;;  %s191_s6 = int_to_ptr.hbm [resolvable:$true] %s190_s6 }
   0xb   : > { %p1074_p3 = pnand %p714_p0, %p164_p2  ;;  %s201_s10 = sshll.u32 %s1215_s3, 4  ;;  %s202_s10 = int_to_ptr.hbm [resolvable:$true] %s201_s10 }
   0xc   : > { %s1011_s11 = smov [#allocation7]   ;;  %s1012_s13 = smov 256  }
   0xd   : > { %p751_p4 = pneg %p1074_p3  ;;  %s192_s12 = sshll.u32 %s1011_s11, 4  ;;  %s193_s12 = int_to_ptr.vmem [resolvable:$true] %s192_s12 }
   0xe   : > { %s1013_s14 = smov 16   ;;  %s1014_s15 = smov [#allocation8]  }
   0xf   : > { %p1086_p6 = pnand %p751_p4, %p44_p1  ;;  %s203_s16 = sshll.u32 %s1014_s15, 4  ;;  %s204_s16 = int_to_ptr.vmem [resolvable:$true] %s203_s16 }
  0x10   : > { %s713_s17 = sadd.s32 4294967294, %s1008_s21   ;;  %s1101_s22 = sadd.s32 1, %s1008_s21  }
  0x11   : > { %754 = dma.hbm_to_vmem [thread:$0]  (!%p1086_p6), %s176_s24, 8192, %s178_s28, [#allocation6], %s1012_s13, %s1012_s13, %s1013_s14  }
  0x12   : > { %757 = dma.hbm_to_vmem [thread:$0]  (!%p1086_p6), %s191_s6, 32, %s193_s12, [#allocation6]  }
  0x13   : > { %760 = dma.hbm_to_vmem [thread:$0]  (!%p1086_p6), %s202_s10, 8192, %s204_s16, [#allocation9], %s1012_s13, %s1012_s13, %s1013_s14  }
  0x14   : > { %s30_s23 = sadd.s32 1, %s1004_s20  ;;  %s27_s24 = ssub.s32 %s1008_s21, %s1101_s22 }
  0x15   : > { %p37_p7 = scmp.ne.s32.totalorder %s1004_s20, %s1000_s19  ;;  %p28_p8 = scmp.eq.s32.totalorder %s27_s24, 0 }
  0x16   : > { %p38_p9 = scmp.eq.s32.totalorder %s1008_s21, 0  ;;  %p43_p10 = scmp.ne.s32.totalorder %s1000_s19, %s996_s18 }
  0x17   : > { %p151_p11 = scmp.eq.s32.totalorder %s1069_s25, 1  ;;  %p157_p0 = scmp.eq.s32.totalorder %s713_s17, 1 }
  0x18   : > { %s1113_s27 = scalar_select %p28_p8, %s1004_s20, %s30_s23  }
  0x19   : > { %p1117_p12 = por %p44_p1, %p43_p10  ;;  %p1121_p13 = por %p151_p11, %p37_p7 }
  0x1a   : > { %p39_p2 = por %p38_p9, %p37_p7  ;;  %s220_s30 = sand.u32 1, %s1004_s20  }
  0x1b   : > { %p1126_p4 = por %p157_p0, %p43_p10  ;;  %p772_p6 = scmp.lt.s32.totalorder %s1008_s21, 2 }
  0x1c   : > { %s719_s7 = sshll.u32 %s220_s30, 4  ;;  %s733_s8 = sshll.u32 %s1008_s21, 4 }
  0x1d   : > { %s229_s11 = scalar_lea.hbm %s1212_s0, %s733_s8  ;;  %s224_s13 = scalar_lea.vmem [#allocation2], %s719_s7 }
  0x1e   : > { %s231_s12 = sshll.u32 %s229_s11, 4  ;;  %s233_s14 = sshll.u32 %s224_s13, 4  ;;  %s232_s12 = int_to_ptr.hbm [resolvable:$true] %s231_s12  ;;  %s234_s14 = int_to_ptr.vmem [resolvable:$true] %s233_s14 }
  0x1f   : > { %p1135_p8 = pnand %p772_p6, %p39_p2  ;;  %s221_s16 = scalar_lea.sflag [#allocation3], %s220_s30 }
  0x20   : > { %s904_s17 = sshra.s32 %s232_s12, 4  ;;  %s911_s7 = scalar_lea.hbm %s1212_s0, 32  ;;  %s905_s17 = int_to_ptr.hbm [resolvable:$true] %s904_s17 }
  0x21   : > { %s906_s23 = scalar_lea.hbm %s905_s17, 16  ;;  %p908_p9 = pneg %p1135_p8 }
  0x22   : > { %p907_p7 = scmp.ne.s32.totalorder %s905_s17, %s906_s23  ;;  %p912_p0 = scmp.lt.s32.totalorder %s905_s17, %s1212_s0 }
  0x23   : > { %p913_p2 = scmp.lt.s32.totalorder %s911_s7, %s906_s23 }
  0x24   : > { %p909_p10 = pnand %p908_p9, %p907_p7 }
  0x25   : > { %p914_p6 = por %p913_p2, %p912_p0 }
  0x26   : > { %p910_p11 = pneg %p909_p10 }
  0x28   : > { %p915_p5 = pnand %p914_p6, %p910_p11 }
  0x2a   : > { %918 = shalt.err (!%p915_p5)
}
  0x2b   : > { %764 = dma.hbm_to_vmem [thread:$0]  (!%p1135_p8), %s232_s12, 256, %s234_s14, %s221_s16  }
  0x2c   : > { %242 = sbr.rel (%p1074_p3) target bundleno = 361 (0x169), region = 40  ;;  %s1152_s30 = sand.u32 (!%p1074_p3), 1, %s1000_s19  }
  0x2d   : > { %s723_s11 = sshll.u32 (!%p1074_p3), %s1152_s30, 4  ;;  %s245_s13 = scalar_lea.sflag (!%p1074_p3), [#allocation3], %s1152_s30 }
  0x2e   : > { %s1158_s17 = scalar_lea.vmem (!%p1074_p3), [#allocation2], %s723_s11 }
  0x31   : > { %979 = dma.done.wait (%p1117_p12), %s245_s13, 256  }
  0x32   : > { %981 = vsyncadd (%p1117_p12), %s245_s13, 4294967040 }
  0x33   : > { %983 = dma.done.wait (%p44_p1), [#allocation6], 8224  }
  0x34   : > { %985 = vsyncadd (%p44_p1), [#allocation6], 4294959072 }
  0x35   : > { %987 = dma.done.wait (%p44_p1), [#allocation9], 8192  }
  0x36   : > { %989 = vsyncadd (%p44_p1), [#allocation9], 4294959104  ;;  %v324_v0 = vld [vmem:[#allocation5 + $0xf8] sm:$0xff]  ;;  %v322_v1 = vld [vmem:[#allocation5 + $0xe8] sm:$0xff]  ;;  %s734_s12 = sshll.u32 %s1069_s25, 4  ;;  %s290_s23 = scalar_lea.vmem [#allocation10], %s723_s11 }
  0x37   : > { %v356_v2 = vld [vmem:[#allocation5 + $0x1f8] sm:$0xff]  ;;  %403 = vmatpush.msra.mxu2 %v324_v0  ;;  %v323_v3 = vld [vmem:[#allocation5 + $0xf0] sm:$0xff]  ;;  %v354_v4 = vld [vmem:[#allocation5 + $0x1e8] sm:$0xff]  ;;  %s609_s16 = scalar_lea.hbm %s1217_s5, %s734_s12  ;;  %s611_s24 = sshll.u32 %s290_s23, 4  ;;  %s612_s24 = int_to_ptr.vmem [resolvable:$true] %s611_s24 }
  0x38   : > { %423 = vmatpush.msra.mxu3 %v356_v2  ;;  %363 = vmatpush.msra.mxu0 %v323_v3  ;;  %v320_v5 = vld [vmem:[#allocation5 + $0xd8] sm:$0xff]  ;;  %v321_v6 = vld [vmem:[#allocation5 + $0xe0] sm:$0xff]  ;;  %v355_v7 = vld [vmem:[#allocation5 + $0x1f0] sm:$0xff]  ;;  %s613_s8 = sshll.u32 %s609_s16, 4  ;;  %s598_s25 = scalar_lea.sflag [#allocation4], %s1152_s30  ;;  %s614_s8 = int_to_ptr.hbm [resolvable:$true] %s613_s8 }
  0x39   : > { %404 = vmatpush.msra.mxu2 %v322_v1  ;;  %v352_v8 = vld [vmem:[#allocation5 + $0x1d8] sm:$0xff]  ;;  %v319_v9 = vld [vmem:[#allocation5 + $0xd0] sm:$0xff]  ;;  %v353_v10 = vld [vmem:[#allocation5 + $0x1e0] sm:$0xff]  ;;  %383 = vmatpush.msra.mxu1 %v355_v7  ;;  %s948_s7 = sshra.s32 %s614_s8, 4  ;;  %s954_s11 = scalar_lea.hbm %s1217_s5, 32  ;;  %s949_s7 = int_to_ptr.hbm [resolvable:$true] %s948_s7 }
  0x3a   : > { %424 = vmatpush.msra.mxu3 %v354_v4  ;;  %364 = vmatpush.msra.mxu0 %v321_v6  ;;  %v318_v11 = vld [vmem:[#allocation5 + $0xc8] sm:$0xff]  ;;  %v317_v13 = vld [vmem:[#allocation5 + $0xc0] sm:$0xff]  ;;  %v351_v14 = vld [vmem:[#allocation5 + $0x1d0] sm:$0xff]  ;;  %s950_s9 = scalar_lea.hbm %s949_s7, 16  ;;  %p955_p12 = scmp.lt.s32.totalorder %s949_s7, %s1217_s5 }
  0x3b   : > { %v350_v12 = vld [vmem:[#allocation5 + $0x1c8] sm:$0xff]  ;;  %405 = vmatpush.msra.mxu2 %v320_v5  ;;  %384 = vmatpush.msra.mxu1 %v353_v10  ;;  %v316_v15 = vld [vmem:[#allocation5 + $0xb8] sm:$0xff]  ;;  %v315_v17 = vld [vmem:[#allocation5 + $0xb0] sm:$0xff]  ;;  %p951_p1 = scmp.ne.s32.totalorder %s949_s7, %s950_s9  ;;  %p956_p8 = scmp.lt.s32.totalorder %s954_s11, %s950_s9 }
  0x3c   : > { %425 = vmatpush.msra.mxu3 %v352_v8  ;;  %365 = vmatpush.msra.mxu0 %v319_v9  ;;  %v348_v16 = vld [vmem:[#allocation5 + $0x1b8] sm:$0xff]  ;;  %v349_v18 = vld [vmem:[#allocation5 + $0x1c0] sm:$0xff]  ;;  %v314_v19 = vld [vmem:[#allocation5 + $0xa8] sm:$0xff] }
  0x3d   : > { %406 = vmatpush.msra.mxu2 %v318_v11  ;;  %385 = vmatpush.msra.mxu1 %v351_v14  ;;  %v346_v20 = vld [vmem:[#allocation5 + $0x1a8] sm:$0xff]  ;;  %v313_v21 = vld [vmem:[#allocation5 + $0xa0] sm:$0xff]  ;;  %v347_v22 = vld [vmem:[#allocation5 + $0x1b0] sm:$0xff]  ;;  %p952_p3 = pnand %p951_p1, %p1121_p13  ;;  %p957_p7 = por %p956_p8, %p955_p12 }
  0x3e   : > { %426 = vmatpush.msra.mxu3 %v350_v12  ;;  %366 = vmatpush.msra.mxu0 %v317_v13  ;;  %v312_v23 = vld [vmem:[#allocation5 + $0x98] sm:$0xff]  ;;  %v311_v25 = vld [vmem:[#allocation5 + $0x90] sm:$0xff]  ;;  %v345_v26 = vld [vmem:[#allocation5 + $0x1a0] sm:$0xff] }
  0x3f   : > { %407 = vmatpush.msra.mxu2 %v316_v15  ;;  %386 = vmatpush.msra.mxu1 %v349_v18  ;;  %v344_v24 = vld [vmem:[#allocation5 + $0x198] sm:$0xff]  ;;  %v310_v27 = vld [vmem:[#allocation5 + $0x88] sm:$0xff]  ;;  %v309_v29 = vld [vmem:[#allocation5 + $0x80] sm:$0xff]  ;;  %p953_p5 = pneg %p952_p3 }
  0x40   : > { %427 = vmatpush.msra.mxu3 %v348_v16  ;;  %367 = vmatpush.msra.mxu0 %v315_v17  ;;  %v342_v28 = vld [vmem:[#allocation5 + $0x188] sm:$0xff]  ;;  %v343_v30 = vld [vmem:[#allocation5 + $0x190] sm:$0xff]  ;;  %v308_v31 = vld [vmem:[#allocation5 + $0x78] sm:$0xff] }
  0x41   : > { %408 = vmatpush.msra.mxu2 %v314_v19  ;;  %387 = vmatpush.msra.mxu1 %v347_v22  ;;  %v340_v32 = vld [vmem:[#allocation5 + $0x178] sm:$0xff]  ;;  %v307_v33 = vld [vmem:[#allocation5 + $0x70] sm:$0xff]  ;;  %v341_v34 = vld [vmem:[#allocation5 + $0x180] sm:$0xff]  ;;  %p958_p9 = pnand %p957_p7, %p953_p5 }
  0x42   : > { %428 = vmatpush.msra.mxu3 %v346_v20  ;;  %368 = vmatpush.msra.mxu0 %v313_v21  ;;  %v306_v35 = vld [vmem:[#allocation5 + $0x68] sm:$0xff]  ;;  %v305_v37 = vld [vmem:[#allocation5 + $0x60] sm:$0xff]  ;;  %v339_v38 = vld [vmem:[#allocation5 + $0x170] sm:$0xff] }
  0x43   : > { %409 = vmatpush.msra.mxu2 %v312_v23  ;;  %388 = vmatpush.msra.mxu1 %v345_v26  ;;  %v338_v36 = vld [vmem:[#allocation5 + $0x168] sm:$0xff]  ;;  %v304_v39 = vld [vmem:[#allocation5 + $0x58] sm:$0xff]  ;;  %v303_v41 = vld [vmem:[#allocation5 + $0x50] sm:$0xff] }
  0x44   : > { %429 = vmatpush.msra.mxu3 %v344_v24  ;;  %369 = vmatpush.msra.mxu0 %v311_v25  ;;  %v336_v40 = vld [vmem:[#allocation5 + $0x158] sm:$0xff]  ;;  %v337_v42 = vld [vmem:[#allocation5 + $0x160] sm:$0xff]  ;;  %v302_v43 = vld [vmem:[#allocation5 + $0x48] sm:$0xff] }
  0x45   : > { %410 = vmatpush.msra.mxu2 %v310_v27  ;;  %389 = vmatpush.msra.mxu1 %v343_v30  ;;  %v334_v44 = vld [vmem:[#allocation5 + $0x148] sm:$0xff]  ;;  %v301_v45 = vld [vmem:[#allocation5 + $0x40] sm:$0xff]  ;;  %v335_v46 = vld [vmem:[#allocation5 + $0x150] sm:$0xff] }
  0x46   : > { %430 = vmatpush.msra.mxu3 %v342_v28  ;;  %370 = vmatpush.msra.mxu0 %v309_v29  ;;  %v300_v47 = vld [vmem:[#allocation5 + $0x38] sm:$0xff]  ;;  %v299_v49 = vld [vmem:[#allocation5 + $0x30] sm:$0xff]  ;;  %v333_v50 = vld [vmem:[#allocation5 + $0x140] sm:$0xff] }
  0x47   : > { %411 = vmatpush.msra.mxu2 %v308_v31  ;;  %390 = vmatpush.msra.mxu1 %v341_v34  ;;  %v332_v48 = vld [vmem:[#allocation5 + $0x138] sm:$0xff]  ;;  %v298_v51 = vld [vmem:[#allocation5 + $0x28] sm:$0xff]  ;;  %v297_v53 = vld [vmem:[#allocation5 + $0x20] sm:$0xff] }
  0x48   : > { %431 = vmatpush.msra.mxu3 %v340_v32  ;;  %371 = vmatpush.msra.mxu0 %v307_v33  ;;  %v330_v52 = vld [vmem:[#allocation5 + $0x128] sm:$0xff]  ;;  %v331_v54 = vld [vmem:[#allocation5 + $0x130] sm:$0xff]  ;;  %v296_v55 = vld [vmem:[#allocation5 + $0x18] sm:$0xff] }
  0x49   : > { %412 = vmatpush.msra.mxu2 %v306_v35  ;;  %391 = vmatpush.msra.mxu1 %v339_v38  ;;  %v328_v56 = vld [vmem:[#allocation5 + $0x118] sm:$0xff]  ;;  %v295_v57 = vld [vmem:[#allocation5 + $0x10] sm:$0xff]  ;;  %v329_v58 = vld [vmem:[#allocation5 + $0x120] sm:$0xff] }
  0x4a   : > { %432 = vmatpush.msra.mxu3 %v338_v36  ;;  %372 = vmatpush.msra.mxu0 %v305_v37  ;;  %v294_v59 = vld [vmem:[#allocation5 + $0x8] sm:$0xff]  ;;  %v291_v61 = vld [vmem:[%s1158_s17] sm:$0xff] }
  0x4b   : > { %413 = vmatpush.msra.mxu2 %v304_v39  ;;  %392 = vmatpush.msra.mxu1 %v337_v42  ;;  %v326_v60 = vld [vmem:[#allocation5 + $0x108] sm:$0xff]  ;;  %v293_v63 = vld [vmem:[#allocation5] sm:$0xff]  ;;  %v327_v0 = vld [vmem:[#allocation5 + $0x110] sm:$0xff] }
  0x4c   : > { %433 = vmatpush.msra.mxu3 %v336_v40  ;;  %373 = vmatpush.msra.mxu0 %v303_v41  ;;  %v292_v62 = vld [vmem:[%s1158_s17 + $0x8] sm:$0xff]  ;;  %v325_v2 = vld [vmem:[#allocation5 + $0x100] sm:$0xff] }
  0x4d   : > { %414 = vmatpush.msra.mxu2 %v302_v43  ;;  %393 = vmatpush.msra.mxu1 %v335_v46  ;;  %v476_v1 = vld [vmem:[#allocation8 + $0xf8] sm:$0xff]  ;;  %v475_v3 = vld [vmem:[#allocation8 + $0xf0] sm:$0xff]  ;;  %v474_v4 = vld [vmem:[#allocation8 + $0xe8] sm:$0xff] }
  0x4e   : > { %434 = vmatpush.msra.mxu3 %v334_v44  ;;  %374 = vmatpush.msra.mxu0 %v301_v45  ;;  %v473_v5 = vld [vmem:[#allocation8 + $0xe0] sm:$0xff]  ;;  %v507_v6 = vld [vmem:[#allocation8 + $0x1f0] sm:$0xff]  ;;  %v508_v7 = vld [vmem:[#allocation8 + $0x1f8] sm:$0xff] }
  0x4f   : > { %415 = vmatpush.msra.mxu2 %v300_v47  ;;  %394 = vmatpush.msra.mxu1 %v333_v50  ;;  %v472_v8 = vld [vmem:[#allocation8 + $0xd8] sm:$0xff]  ;;  %v471_v9 = vld [vmem:[#allocation8 + $0xd0] sm:$0xff]  ;;  %v505_v10 = vld [vmem:[#allocation8 + $0x1e0] sm:$0xff] }
  0x50   : > { %435 = vmatpush.msra.mxu3 %v332_v48  ;;  %375 = vmatpush.msra.mxu0 %v299_v49  ;;  %v506_v11 = vld [vmem:[#allocation8 + $0x1e8] sm:$0xff]  ;;  %v469_v13 = vld [vmem:[#allocation8 + $0xc0] sm:$0xff]  ;;  %v503_v14 = vld [vmem:[#allocation8 + $0x1d0] sm:$0xff] }
  0x51   : > { %416 = vmatpush.msra.mxu2 %v298_v51  ;;  %395 = vmatpush.msra.mxu1 %v331_v54  ;;  %v470_v12 = vld [vmem:[#allocation8 + $0xc8] sm:$0xff]  ;;  %v504_v15 = vld [vmem:[#allocation8 + $0x1d8] sm:$0xff]  ;;  %v467_v17 = vld [vmem:[#allocation8 + $0xb0] sm:$0xff] }
  0x52   : > { %436 = vmatpush.msra.mxu3 %v330_v52  ;;  %376 = vmatpush.msra.mxu0 %v297_v53  ;;  %v468_v16 = vld [vmem:[#allocation8 + $0xb8] sm:$0xff]  ;;  %v501_v18 = vld [vmem:[#allocation8 + $0x1c0] sm:$0xff]  ;;  %v502_v19 = vld [vmem:[#allocation8 + $0x1c8] sm:$0xff] }
  0x53   : > { %417 = vmatpush.msra.mxu2 %v296_v55  ;;  %396 = vmatpush.msra.mxu1 %v329_v58  ;;  %v466_v20 = vld [vmem:[#allocation8 + $0xa8] sm:$0xff]  ;;  %v465_v21 = vld [vmem:[#allocation8 + $0xa0] sm:$0xff]  ;;  %v499_v22 = vld [vmem:[#allocation8 + $0x1b0] sm:$0xff] }
  0x54   : > { %437 = vmatpush.msra.mxu3 %v328_v56  ;;  %377 = vmatpush.msra.mxu0 %v295_v57  ;;  %v500_v23 = vld [vmem:[#allocation8 + $0x1b8] sm:$0xff]  ;;  %v463_v25 = vld [vmem:[#allocation8 + $0x90] sm:$0xff]  ;;  %v497_v26 = vld [vmem:[#allocation8 + $0x1a0] sm:$0xff] }
  0x55   : > { %418 = vmatpush.msra.mxu2 %v294_v59  ;;  %397 = vmatpush.msra.mxu1 %v327_v0  ;;  %v464_v24 = vld [vmem:[#allocation8 + $0x98] sm:$0xff]  ;;  %v498_v27 = vld [vmem:[#allocation8 + $0x1a8] sm:$0xff]  ;;  %v461_v29 = vld [vmem:[#allocation8 + $0x80] sm:$0xff] }
  0x56   : > { %438 = vmatpush.msra.mxu3 %v326_v60  ;;  %419 = vmatmul.f32.vlgmr.msra.gmra.mxu2 %v291_v61  ;;  %v462_v28 = vld [vmem:[#allocation8 + $0x88] sm:$0xff]  ;;  %v495_v30 = vld [vmem:[#allocation8 + $0x190] sm:$0xff]  ;;  %v496_v31 = vld [vmem:[#allocation8 + $0x198] sm:$0xff] }
  0x57   : > { %439 = vmatmul.f32.vlgmr.msra.gmra.mxu3 %v292_v62  ;;  %378 = vmatpush.msra.mxu0 %v293_v63  ;;  %v460_v32 = vld [vmem:[#allocation8 + $0x78] sm:$0xff]  ;;  %v459_v33 = vld [vmem:[#allocation8 + $0x70] sm:$0xff]  ;;  %v493_v34 = vld [vmem:[#allocation8 + $0x180] sm:$0xff] }
  0x58   : > { %379 = vmatmul.f32.vlgmr.msra.gmra.mxu0 %v291_v61  ;;  %555 = vmatpush.msrb.mxu2 %v476_v1  ;;  %v494_v35 = vld [vmem:[#allocation8 + $0x188] sm:$0xff]  ;;  %v457_v37 = vld [vmem:[#allocation8 + $0x60] sm:$0xff]  ;;  %v491_v38 = vld [vmem:[#allocation8 + $0x170] sm:$0xff] }
  0x59   : > { %398 = vmatpush.msra.mxu1 %v325_v2  ;;  %515 = vmatpush.msrb.mxu0 %v475_v3  ;;  %v458_v36 = vld [vmem:[#allocation8 + $0x68] sm:$0xff]  ;;  %v492_v39 = vld [vmem:[#allocation8 + $0x178] sm:$0xff]  ;;  %v455_v41 = vld [vmem:[#allocation8 + $0x50] sm:$0xff] }
  0x5a   : > { %399 = vmatmul.f32.vlgmr.msra.gmra.mxu1 %v292_v62  ;;  %556 = vmatpush.msrb.mxu2 %v474_v4  ;;  %v456_v40 = vld [vmem:[#allocation8 + $0x58] sm:$0xff]  ;;  %v489_v42 = vld [vmem:[#allocation8 + $0x160] sm:$0xff]  ;;  %v490_v43 = vld [vmem:[#allocation8 + $0x168] sm:$0xff] }
  0x5b   : > { %516 = vmatpush.msrb.mxu0 %v473_v5  ;;  %535 = vmatpush.msrb.mxu1 %v507_v6  ;;  %v454_v44 = vld [vmem:[#allocation8 + $0x48] sm:$0xff]  ;;  %v453_v45 = vld [vmem:[#allocation8 + $0x40] sm:$0xff]  ;;  %v487_v46 = vld [vmem:[#allocation8 + $0x150] sm:$0xff] }
  0x5c   : > { %575 = vmatpush.msrb.mxu3 %v508_v7  ;;  %557 = vmatpush.msrb.mxu2 %v472_v8  ;;  %v488_v47 = vld [vmem:[#allocation8 + $0x158] sm:$0xff]  ;;  %v451_v48 = vld [vmem:[#allocation8 + $0x30] sm:$0xff]  ;;  %v485_v49 = vld [vmem:[#allocation8 + $0x140] sm:$0xff] }
  0x5d   : > { %517 = vmatpush.msrb.mxu0 %v471_v9  ;;  %536 = vmatpush.msrb.mxu1 %v505_v10  ;;  %v452_v50 = vld [vmem:[#allocation8 + $0x38] sm:$0xff]  ;;  %v486_v51 = vld [vmem:[#allocation8 + $0x148] sm:$0xff]  ;;  %v449_v52 = vld [vmem:[#allocation8 + $0x20] sm:$0xff] }
  0x5e   : > { %576 = vmatpush.msrb.mxu3 %v506_v11  ;;  %558 = vmatpush.msrb.mxu2 %v470_v12  ;;  %v483_v53 = vld [vmem:[#allocation8 + $0x130] sm:$0xff]  ;;  %v450_v54 = vld [vmem:[#allocation8 + $0x28] sm:$0xff]  ;;  %v484_v55 = vld [vmem:[#allocation8 + $0x138] sm:$0xff] }
  0x5f   : > { %518 = vmatpush.msrb.mxu0 %v469_v13  ;;  %537 = vmatpush.msrb.mxu1 %v503_v14  ;;  %v447_v56 = vld [vmem:[#allocation8 + $0x10] sm:$0xff]  ;;  %v481_v57 = vld [vmem:[#allocation8 + $0x120] sm:$0xff]  ;;  %v448_v58 = vld [vmem:[#allocation8 + $0x18] sm:$0xff] }
  0x60   : > { %577 = vmatpush.msrb.mxu3 %v504_v15  ;;  %559 = vmatpush.msrb.mxu2 %v468_v16  ;;  %v482_v59 = vld [vmem:[#allocation8 + $0x128] sm:$0xff]  ;;  %v445_v60 = vld [vmem:[#allocation8] sm:$0xff]  ;;  %v479_v61 = vld [vmem:[#allocation8 + $0x110] sm:$0xff] }
  0x61   : > { %519 = vmatpush.msrb.mxu0 %v467_v17  ;;  %538 = vmatpush.msrb.mxu1 %v501_v18  ;;  %v446_v62 = vld [vmem:[#allocation8 + $0x8] sm:$0xff]  ;;  %v480_v63 = vld [vmem:[#allocation8 + $0x118] sm:$0xff]  ;;  %v477_v0 = vld [vmem:[#allocation8 + $0x100] sm:$0xff] }
  0x62   : > { %578 = vmatpush.msrb.mxu3 %v502_v19  ;;  %560 = vmatpush.msrb.mxu2 %v466_v20  ;;  %v478_v1 = vld [vmem:[#allocation8 + $0x108] sm:$0xff]  ;;  %v357_v2 = vld [vmem:[#allocation7] sm:$0x3] }
  0x63   : > { %520 = vmatpush.msrb.mxu0 %v465_v21  ;;  %539 = vmatpush.msrb.mxu1 %v499_v22  ;;  %v359_v3 = vperm.slane %v357_v2, 0  ;;  %v360_v6 = vperm.slane %v357_v2, 1  ;;  %v509_v15 = vld [vmem:[%s1216_s4] sm:$0x3] }
  0x64   : > { %579 = vmatpush.msrb.mxu3 %v500_v23  ;;  %561 = vmatpush.msrb.mxu2 %v464_v24  ;;  %v511_v16 = vperm.slane %v509_v15, 0  ;;  %v512_v19 = vperm.slane %v509_v15, 1 }
  0x65   : > { %521 = vmatpush.msrb.mxu0 %v463_v25  ;;  %540 = vmatpush.msrb.mxu1 %v497_v26 }
  0x66   : > { %580 = vmatpush.msrb.mxu3 %v498_v27  ;;  %562 = vmatpush.msrb.mxu2 %v462_v28 }
  0x67   : > { %522 = vmatpush.msrb.mxu0 %v461_v29  ;;  %541 = vmatpush.msrb.mxu1 %v495_v30 }
  0x68   : > { %581 = vmatpush.msrb.mxu3 %v496_v31  ;;  %563 = vmatpush.msrb.mxu2 %v460_v32 }
  0x69   : > { %523 = vmatpush.msrb.mxu0 %v459_v33  ;;  %542 = vmatpush.msrb.mxu1 %v493_v34 }
  0x6a   : > { %582 = vmatpush.msrb.mxu3 %v494_v35  ;;  %564 = vmatpush.msrb.mxu2 %v458_v36 }
  0x6b   : > { %524 = vmatpush.msrb.mxu0 %v457_v37  ;;  %543 = vmatpush.msrb.mxu1 %v491_v38 }
  0x6c   : > { %583 = vmatpush.msrb.mxu3 %v492_v39  ;;  %565 = vmatpush.msrb.mxu2 %v456_v40 }
  0x6d   : > { %525 = vmatpush.msrb.mxu0 %v455_v41  ;;  %544 = vmatpush.msrb.mxu1 %v489_v42 }
  0x6e   : > { %584 = vmatpush.msrb.mxu3 %v490_v43  ;;  %566 = vmatpush.msrb.mxu2 %v454_v44 }
  0x6f   : > { %526 = vmatpush.msrb.mxu0 %v453_v45  ;;  %545 = vmatpush.msrb.mxu1 %v487_v46 }
  0x70   : > { %585 = vmatpush.msrb.mxu3 %v488_v47  ;;  %567 = vmatpush.msrb.mxu2 %v452_v50 }
  0x71   : > { %527 = vmatpush.msrb.mxu0 %v451_v48  ;;  %546 = vmatpush.msrb.mxu1 %v485_v49 }
  0x72   : > { %586 = vmatpush.msrb.mxu3 %v486_v51  ;;  %568 = vmatpush.msrb.mxu2 %v450_v54 }
  0x73   : > { %528 = vmatpush.msrb.mxu0 %v449_v52  ;;  %547 = vmatpush.msrb.mxu1 %v483_v53 }
  0x74   : > { %587 = vmatpush.msrb.mxu3 %v484_v55  ;;  %569 = vmatpush.msrb.mxu2 %v448_v58 }
  0x75   : > { %529 = vmatpush.msrb.mxu0 %v447_v56  ;;  %548 = vmatpush.msrb.mxu1 %v481_v57 }
  0x76   : > { %588 = vmatpush.msrb.mxu3 %v482_v59  ;;  %570 = vmatpush.msrb.mxu2 %v446_v62 }
  0x77   : > { %530 = vmatpush.msrb.mxu0 %v445_v60  ;;  %549 = vmatpush.msrb.mxu1 %v479_v61 }
  0x78   : > { %589 = vmatpush.msrb.mxu3 %v480_v63 }
  0x79   : > { %550 = vmatpush.msrb.mxu1 %v477_v0 }
  0x7a   : > { %590 = vmatpush.msrb.mxu3 %v478_v1 }
  0xd5   : > { %v380_v4 = vpop.f32.mrf.mxu0 }
  0xd6   : > { %v381_v5 = vadd.f32 %v380_v4, %v359_v3 }
  0xd7   : > { %v400_v7 = vpop.f32.mrf.mxu1 }
  0xd8   : > { %v401_v8 = vadd.f32 %v400_v7, %v381_v5 }
  0xd9   : > { %v420_v9 = vpop.f32.mrf.mxu2 }
  0xda   : > { %v440_v10 = vpop.f32.mrf.mxu3  ;;  %v443_v11 = vmax.f32 %v401_v8, 0.0  ;;  %v421_v12 = vadd.f32 %v420_v9, %v360_v6 }
  0xdc   : > { %v441_v13 = vadd.f32 %v440_v10, %v421_v12  ;;  %531 = vmatmul.f32.vlgmr.msrb.gmra.mxu0 %v443_v11  ;;  %571 = vmatmul.f32.vlgmr.msrb.gmra.mxu2 %v443_v11 }
  0xde   : > { %v444_v14 = vmax.f32 %v441_v13, 0.0 }
  0xe0   : > { %551 = vmatmul.f32.vlgmr.msrb.gmra.mxu1 %v444_v14  ;;  %591 = vmatmul.f32.vlgmr.msrb.gmra.mxu3 %v444_v14 }
 0x159   : > { %v532_v17 = vpop.f32.mrf.mxu0 }
 0x15a   : > { %v533_v18 = vadd.f32 %v532_v17, %v511_v16 }
 0x15d   : > { %v552_v20 = vpop.f32.mrf.mxu1 }
 0x15e   : > { %v553_v21 = vadd.f32 %v552_v20, %v533_v18 }
 0x15f   : > { %v572_v22 = vpop.f32.mrf.mxu2 }
 0x160   : > { %595 = vst [vmem:[%s290_s23] sm:$0xff] %v553_v21  ;;  %v573_v23 = vadd.f32 %v572_v22, %v512_v19 }
 0x163   : > { %v592_v24 = vpop.f32.mrf.mxu3 }
 0x164   : > { %v593_v25 = vadd.f32 %v592_v24, %v573_v23 }
 0x166   : > { %596 = vst [vmem:[%s290_s23 + $0x8] sm:$0xff] %v593_v25 }
 0x167   : > { %961 = shalt.err (!%p958_p9)
}
 0x168   : > { %749 = dma.vmem_to_hbm [thread:$0]  (%p1121_p13), %s612_s24, 256, %s614_s8, %s598_s25  }
 0x169 PF: > { %s625_s30 = sand.u32 1, %s996_s18   ;;  %p1224_p10 = scmp.ge.s32.totalorder %s1008_s21, 2 }
 0x16a   : > { %s626_s28 = scalar_lea.sflag [#allocation4], %s625_s30 }
 0x16b   : > { %p766_p11 = pnand %p1224_p10, %p1126_p4 }
 0x16d   : > { %p767_p0 = pneg %p766_p11 }
 0x16f   : > { %991 = dma.done.wait (%p767_p0), %s626_s28, 256  }
 0x170   : > { %993 = vsyncadd (%p767_p0), %s626_s28, 4294967040  ;;  %p20_p2 = scmp.ge.s32.totalorder %s1101_s22, 4   ;;  %s1225_s18 = smov %s1000_s19 }
 0x171   : > { %s1226_s19 = smov %s1004_s20  ;;  %s1227_s20 = smov %s1113_s27 }
 0x172   : > { %s1228_s21 = smov %s1101_s22  ;;  %22 = sbr.rel (!%p20_p2) target bundleno = 7 (0x7), region = 97 }
 0x177   :  { %632 = vsyncpa [#allocation3], 1 }
 0x178   :  { %634 = vsyncpa [#allocation3 + $0x1], 1 }
 0x179   :  { %635 = vsyncpa [#allocation6], 1 }
 0x17a   :  { %636 = vsyncpa [#allocation9], 1 }
 0x17b   :  { %637 = vsyncpa [#allocation4], 1 }
 0x17c   :  { %639 = vsyncpa [#allocation4 + $0x1], 1 }

</bundles_post_ra>
